<compile_context>
chip_gen: v5e
topology: v5e:2x2
jax: 0.10.0
libtpu: 0.0.40
codegen_flags: <defaults>
</compile_context>

<pallas_src>
import math

import jax
import jax.numpy as jnp
from jax.experimental import pallas as pl
from jax.experimental.pallas import tpu as pltpu


def _round_up(n, m):
    return (n + m - 1) // m * m


def _resident_spec(block_shape, index_map):
    """BlockSpec for grid-invariant operands: single-buffered to save VMEM."""
    try:
        return pl.BlockSpec(block_shape, index_map, pipeline_mode=pl.Buffered(1))
    except (AttributeError, TypeError):
        # Older JAX without pipeline_mode: fall back to default double-buffering.
        return pl.BlockSpec(block_shape, index_map)


def _default_vmem_limit_bytes():
    """~85% of this chip's VMEM, leaving headroom for Mosaic-internal scratch."""
    try:
        cap = pltpu.get_tpu_info().vmem_capacity_bytes
    except Exception:
        cap = 64 * 1024 * 1024  # conservative default, valid on every generation
    return max(32 * 1024 * 1024, min(int(cap * 0.85), 112 * 1024 * 1024))


def _lm_head_kernel(x_ref, wd_ref, bd_ref, gamma_ref, beta_ref,
                    wo_ref, bias_ref, out_ref, h_ref):
    # ---- Stage 1: h = LayerNorm(gelu(x @ Wd^T + bd)) -- once per token tile.
    @pl.when(pl.program_id(1) == 0)
    def _():
        # dense: contract last dims of x (TM, E) and Wd (E_out, E_in) -> x @ Wd^T
        h = jax.lax.dot_general(
            x_ref[...], wd_ref[...],
            dimension_numbers=(((1,), (1,)), ((), ())),
            preferred_element_type=jnp.float32)
        h = h + bd_ref[...].astype(jnp.float32)

        # exact erf-based GELU: x * 0.5 * (1 + erf(x / sqrt(2)))
        h = h * 0.5 * (1.0 + jax.lax.erf(h * (1.0 / math.sqrt(2.0))))

        # LayerNorm over the (un-tiled) embedding dim, eps = 1e-5, affine
        mean = jnp.mean(h, axis=-1, keepdims=True)
        c = h - mean
        var = jnp.mean(c * c, axis=-1, keepdims=True)
        h = c * jax.lax.rsqrt(var + 1e-5)
        h = h * gamma_ref[...].astype(jnp.float32) + beta_ref[...].astype(jnp.float32)

        # cache in the matmul (compute) dtype so the inner loop needs no cast
        h_ref[...] = h.astype(h_ref.dtype)

    # ---- Stage 2 (every grid step): logits tile = h @ Wo_tile^T + bias_tile
    out = jax.lax.dot_general(
        h_ref[...], wo_ref[...],
        dimension_numbers=(((1,), (1,)), ((), ())),
        preferred_element_type=jnp.float32)
    out = out + bias_ref[...].astype(jnp.float32)
    out_ref[...] = out.astype(out_ref.dtype)


def roberta_lm_head(x, dense_w, dense_b, ln_gamma, ln_beta, weight, bias,
                    masked_tokens=None, out_dtype=None,
                    compute_dtype=jnp.bfloat16, tm=1024, tv=2048):
    """RobertaLMHead forward.

    x:        (..., E) activations
    dense_w:  (E, E)   torch Linear weight (out, in)
    dense_b:  (E,)
    ln_gamma: (E,)
    ln_beta:  (E,)
    weight:   (V, E)   shared embedding matrix (torch layout)
    bias:     (V,)

    compute_dtype: dtype of the MXU operands (bf16 by default; f32 accumulation
        is always used).  out_dtype defaults to x.dtype to preserve the module
        semantics; pass jnp.bfloat16 to halve the logits write stream.
    """
    if masked_tokens is not None:
        # TODO(synk): boolean-mask gather has a data-dependent shape; done in JAX glue.
        x = x[masked_tokens, :]

    orig_lead = x.shape[:-1]
    E = x.shape[-1]
    V = weight.shape[0]
    out_dtype = x.dtype if out_dtype is None else out_dtype
    compute_dtype = jnp.dtype(compute_dtype)

    x2 = x.reshape(-1, E)
    N = x2.shape[0]

    # Sublane multiple for the compute dtype (f32 -> 8, bf16 -> 16, 8-bit -> 32).
    sub = {4: 8, 2: 16, 1: 32}.get(compute_dtype.itemsize, 8)

    try:
        num_tc = int(getattr(jax.devices()[0], "num_cores", 1) or 1)
    except Exception:
        num_tc = 1

    if N > tm:
        TM = tm
    else:
        # Small-N fallback: sublane-aligned tile; when the chip exposes >1
        # TensorCore, split the token axis so both cores get work.
        TM = _round_up(max(N, 1), sub)
        if num_tc > 1 and N > sub:
            TM = min(TM, _round_up(-(-N // num_tc), sub))
    # Vocab tiles stay multiples of 256 (2x256^2 MXU; lane-dense unmasked stores).
    TV = tv if V >= tv else _round_up(V, 256)

    N_pad = _round_up(N, TM)
    V_pad = _round_up(V, TV)

    # bf16 operands: halves the dominant weight HBM traffic and uses the fast
    # MXU path (f32 accumulation happens inside the kernel).  Ideally `weight`
    # is already stored in bf16 so this cast is free.
    x2 = x2.astype(compute_dtype)
    wd = dense_w.astype(compute_dtype)
    w_p = weight.astype(compute_dtype)

    if N_pad != N:
        x2 = jnp.pad(x2, ((0, N_pad - N), (0, 0)))
    b_p = bias
    if V_pad != V:
        w_p = jnp.pad(w_p, ((0, V_pad - V), (0, 0)))
        b_p = jnp.pad(bias, ((0, V_pad - V),))

    grid = (N_pad // TM, V_pad // TV)

    out = pl.pallas_call(
        _lm_head_kernel,
        out_shape=jax.ShapeDtypeStruct((N_pad, V_pad), out_dtype),
        grid_spec=pltpu.PrefetchScalarGridSpec(
            num_scalar_prefetch=0,
            grid=grid,
            in_specs=[
                pl.BlockSpec((TM, E), lambda i, j: (i, 0)),      # x tile (streamed over i)
                _resident_spec((E, E), lambda i, j: (0, 0)),     # dense W (resident, 1-buf)
                _resident_spec((1, E), lambda i, j: (0, 0)),     # dense b
                _resident_spec((1, E), lambda i, j: (0, 0)),     # LN gamma
                _resident_spec((1, E), lambda i, j: (0, 0)),     # LN beta
                pl.BlockSpec((TV, E), lambda i, j: (j, 0)),      # Wo tile (torch (V,E) layout)
                pl.BlockSpec((1, TV), lambda i, j: (0, j)),      # bias tile
            ],
            out_specs=pl.BlockSpec((TM, TV), lambda i, j: (i, j)),
            scratch_shapes=[pltpu.VMEM((TM, E), compute_dtype)],  # cached h
        ),
        compiler_params=pltpu.CompilerParams(
            dimension_semantics=("parallel", "arbitrary"),
            vmem_limit_bytes=_default_vmem_limit_bytes(),
        ),
    )(
        x2,
        wd,
        dense_b.astype(jnp.float32).reshape(1, E),
        ln_gamma.astype(jnp.float32).reshape(1, E),
        ln_beta.astype(jnp.float32).reshape(1, E),
        w_p,
        b_p.astype(jnp.float32).reshape(1, V_pad),
    )

    out = out[:N, :V]
    return out.reshape(orig_lead + (V,))


if __name__ == "__main__":
    key = jax.random.PRNGKey(0)
    batch, seq, emb_dim, out_dim = 2, 8, 32, 48

    k1, k2, k3 = jax.random.split(key, 3)
    x = jax.random.normal(k1, (batch, seq, emb_dim), dtype=jnp.float32)

    # deterministic parameter init (synthetic, matches module shapes)
    dense_w = jax.random.normal(k2, (emb_dim, emb_dim), jnp.float32) * 0.02
    dense_b = jnp.zeros((emb_dim,), jnp.float32)
    ln_gamma = jnp.ones((emb_dim,), jnp.float32)
    ln_beta = jnp.zeros((emb_dim,), jnp.float32)
    weight = jax.random.normal(k3, (out_dim, emb_dim), jnp.float32) * 0.02
    bias = jnp.zeros((out_dim,), jnp.float32)

    out = roberta_lm_head(x, dense_w, dense_b, ln_gamma, ln_beta, weight, bias)
    jax.block_until_ready(out)

    # reference check in plain JAX (f32; kernel runs bf16 operands + f32 accum,
    # so the tolerance is loosened accordingly)
    h_ref = x @ dense_w.T + dense_b
    h_ref = h_ref * 0.5 * (1.0 + jax.lax.erf(h_ref / math.sqrt(2.0)))
    mu = jnp.mean(h_ref, -1, keepdims=True)
    var = jnp.mean((h_ref - mu) ** 2, -1, keepdims=True)
    h_ref = (h_ref - mu) * jax.lax.rsqrt(var + 1e-5) * ln_gamma + ln_beta
    ref = h_ref @ weight.T + bias

    assert out.shape == (batch, seq, out_dim)
    err = float(jnp.max(jnp.abs(out.astype(jnp.float32) - ref)))
    assert jnp.allclose(out.astype(jnp.float32), ref, atol=2e-2, rtol=2e-2), err

    print("KERNEL_OK")
</pallas_src>

<mosaic_0001>
module attributes {stable_mosaic.version = 11 : i64} {
  func.func @_lm_head_kernel(%arg0: i32, %arg1: i32, %arg2: memref<16x32xbf16, #tpu.memory_space<vmem>>, %arg3: memref<32x32xbf16, #tpu.memory_space<vmem>>, %arg4: memref<1x32xf32, #tpu.memory_space<vmem>>, %arg5: memref<1x32xf32, #tpu.memory_space<vmem>>, %arg6: memref<1x32xf32, #tpu.memory_space<vmem>>, %arg7: memref<256x32xbf16, #tpu.memory_space<vmem>>, %arg8: memref<1x256xf32, #tpu.memory_space<vmem>>, %arg9: memref<16x256xf32, #tpu.memory_space<vmem>>, %arg10: memref<16x32xbf16, #tpu.memory_space<vmem>>) attributes {dimension_semantics = [#tpu.dimension_semantics<parallel>, #tpu.dimension_semantics<arbitrary>], iteration_bounds = array<i64: 1, 1>, scalar_prefetch = 0 : i64, scratch_operands = 1 : i64, tpu.core_type = #tpu.core_type<tc>, window_params = [{transform_indices = @transform_0, window_bounds = array<i64: 16, 32>}, {pipeline_mode = #tpu.pipeline_mode<synchronous>, transform_indices = @transform_1, window_bounds = array<i64: 32, 32>}, {pipeline_mode = #tpu.pipeline_mode<synchronous>, transform_indices = @transform_2, window_bounds = array<i64: 1, 32>}, {pipeline_mode = #tpu.pipeline_mode<synchronous>, transform_indices = @transform_3, window_bounds = array<i64: 1, 32>}, {pipeline_mode = #tpu.pipeline_mode<synchronous>, transform_indices = @transform_4, window_bounds = array<i64: 1, 32>}, {transform_indices = @transform_5, window_bounds = array<i64: 256, 32>}, {transform_indices = @transform_6, window_bounds = array<i64: 1, 256>}, {transform_indices = @transform_7, window_bounds = array<i64: 16, 256>}]} {
    %c0_i32 = arith.constant 0 : i32
    %0 = arith.cmpi eq, %arg1, %c0_i32 : i32
    %1 = arith.extui %0 : i1 to i32
    %c0_i32_0 = arith.constant 0 : i32
    %2 = arith.cmpi ne, %1, %c0_i32_0 : i32
    scf.if %2 {
      %c0_8 = arith.constant 0 : index
      %c0_9 = arith.constant 0 : index
      %10 = vector.load %arg2[%c0_8, %c0_9] : memref<16x32xbf16, #tpu.memory_space<vmem>>, vector<16x32xbf16>
      %c0_10 = arith.constant 0 : index
      %c0_11 = arith.constant 0 : index
      %11 = vector.load %arg3[%c0_10, %c0_11] : memref<32x32xbf16, #tpu.memory_space<vmem>>, vector<32x32xbf16>
      %cst_12 = arith.constant dense<0.000000e+00> : vector<16x32xf32>
      %12 = tpu.matmul %10, %11, %cst_12 {dimension_numbers = #tpu.dot_dimension_numbers<[1], [1], [0], [0], [0, 0, 1, 0], [], []>} : vector<16x32xbf16>, vector<32x32xbf16>, vector<16x32xf32> -> vector<16x32xf32>
      %c0_13 = arith.constant 0 : index
      %c0_14 = arith.constant 0 : index
      %13 = vector.load %arg4[%c0_13, %c0_14] : memref<1x32xf32, #tpu.memory_space<vmem>>, vector<1x32xf32>
      %14 = vector.broadcast %13 : vector<1x32xf32> to vector<16x32xf32>
      %15 = arith.addf %12, %14 : vector<16x32xf32>
      %cst_15 = arith.constant 5.000000e-01 : f32
      %16 = vector.broadcast %cst_15 : f32 to vector<16x32xf32>
      %17 = arith.mulf %15, %16 : vector<16x32xf32>
      %cst_16 = arith.constant 0.707106769 : f32
      %18 = vector.broadcast %cst_16 : f32 to vector<16x32xf32>
      %19 = arith.mulf %15, %18 : vector<16x32xf32>
      %20 = math.erf %19 : vector<16x32xf32>
      %cst_17 = arith.constant 1.000000e+00 : f32
      %21 = vector.broadcast %cst_17 : f32 to vector<16x32xf32>
      %22 = arith.addf %21, %20 : vector<16x32xf32>
      %23 = arith.mulf %17, %22 : vector<16x32xf32>
      %cst_18 = arith.constant dense<0.000000e+00> : vector<16xf32>
      %24 = vector.multi_reduction <add>, %23, %cst_18 [1] : vector<16x32xf32> to vector<16xf32>
      %25 = vector.shape_cast %24 : vector<16xf32> to vector<16x1xf32>
      %cst_19 = arith.constant 3.200000e+01 : f32
      %26 = vector.broadcast %cst_19 : f32 to vector<16x1xf32>
      %27 = arith.divf %25, %26 : vector<16x1xf32>
      %28 = vector.broadcast %27 : vector<16x1xf32> to vector<16x32xf32>
      %29 = arith.subf %23, %28 : vector<16x32xf32>
      %30 = arith.mulf %29, %29 : vector<16x32xf32>
      %cst_20 = arith.constant dense<0.000000e+00> : vector<16xf32>
      %31 = vector.multi_reduction <add>, %30, %cst_20 [1] : vector<16x32xf32> to vector<16xf32>
      %32 = vector.shape_cast %31 : vector<16xf32> to vector<16x1xf32>
      %cst_21 = arith.constant 3.200000e+01 : f32
      %33 = vector.broadcast %cst_21 : f32 to vector<16x1xf32>
      %34 = arith.divf %32, %33 : vector<16x1xf32>
      %cst_22 = arith.constant 9.99999974E-6 : f32
      %35 = vector.broadcast %cst_22 : f32 to vector<16x1xf32>
      %36 = arith.addf %34, %35 : vector<16x1xf32>
      %37 = math.rsqrt %36 : vector<16x1xf32>
      %38 = vector.broadcast %37 : vector<16x1xf32> to vector<16x32xf32>
      %39 = arith.mulf %29, %38 : vector<16x32xf32>
      %c0_23 = arith.constant 0 : index
      %c0_24 = arith.constant 0 : index
      %40 = vector.load %arg5[%c0_23, %c0_24] : memref<1x32xf32, #tpu.memory_space<vmem>>, vector<1x32xf32>
      %41 = vector.broadcast %40 : vector<1x32xf32> to vector<16x32xf32>
      %42 = arith.mulf %39, %41 : vector<16x32xf32>
      %c0_25 = arith.constant 0 : index
      %c0_26 = arith.constant 0 : index
      %43 = vector.load %arg6[%c0_25, %c0_26] : memref<1x32xf32, #tpu.memory_space<vmem>>, vector<1x32xf32>
      %44 = vector.broadcast %43 : vector<1x32xf32> to vector<16x32xf32>
      %45 = arith.addf %42, %44 : vector<16x32xf32>
      %46 = arith.truncf %45 : vector<16x32xf32> to vector<16x32xbf16>
      %c0_27 = arith.constant 0 : index
      %c0_28 = arith.constant 0 : index
      %47 = vector.load %arg10[%c0_27, %c0_28] : memref<16x32xbf16, #tpu.memory_space<vmem>>, vector<16x32xbf16>
      tpu.vector_store %arg10[%c0_27, %c0_28], %46 {strides = array<i32>} : memref<16x32xbf16, #tpu.memory_space<vmem>>, vector<16x32xbf16>,
    } else {
    }
    %c0 = arith.constant 0 : index
    %c0_1 = arith.constant 0 : index
    %3 = vector.load %arg10[%c0, %c0_1] : memref<16x32xbf16, #tpu.memory_space<vmem>>, vector<16x32xbf16>
    %c0_2 = arith.constant 0 : index
    %c0_3 = arith.constant 0 : index
    %4 = vector.load %arg7[%c0_2, %c0_3] : memref<256x32xbf16, #tpu.memory_space<vmem>>, vector<256x32xbf16>
    %cst = arith.constant dense<0.000000e+00> : vector<16x256xf32>
    %5 = tpu.matmul %3, %4, %cst {dimension_numbers = #tpu.dot_dimension_numbers<[1], [1], [0], [0], [0, 0, 1, 0], [], []>} : vector<16x32xbf16>, vector<256x32xbf16>, vector<16x256xf32> -> vector<16x256xf32>
    %c0_4 = arith.constant 0 : index
    %c0_5 = arith.constant 0 : index
    %6 = vector.load %arg8[%c0_4, %c0_5] : memref<1x256xf32, #tpu.memory_space<vmem>>, vector<1x256xf32>
    %7 = vector.broadcast %6 : vector<1x256xf32> to vector<16x256xf32>
    %8 = arith.addf %5, %7 : vector<16x256xf32>
    %c0_6 = arith.constant 0 : index
    %c0_7 = arith.constant 0 : index
    %9 = vector.load %arg9[%c0_6, %c0_7] : memref<16x256xf32, #tpu.memory_space<vmem>>, vector<16x256xf32>
    tpu.vector_store %arg9[%c0_6, %c0_7], %8 {strides = array<i32>} : memref<16x256xf32, #tpu.memory_space<vmem>>, vector<16x256xf32>,
    return
  }
  func.func @transform_0(%arg0: i32, %arg1: i32) -> (i32, i32) {
    %c0_i32 = arith.constant 0 : i32
    %c0_i32_0 = arith.constant 0 : i32
    return %arg0, %c0_i32 : i32, i32
  }
  func.func @transform_1(%arg0: i32, %arg1: i32) -> (i32, i32) {
    %c0_i32 = arith.constant 0 : i32
    %c0_i32_0 = arith.constant 0 : i32
    %c0_i32_1 = arith.constant 0 : i32
    return %c0_i32, %c0_i32_0 : i32, i32
  }
  func.func @transform_2(%arg0: i32, %arg1: i32) -> (i32, i32) {
    %c0_i32 = arith.constant 0 : i32
    %c0_i32_0 = arith.constant 0 : i32
    %c0_i32_1 = arith.constant 0 : i32
    return %c0_i32, %c0_i32_0 : i32, i32
  }
  func.func @transform_3(%arg0: i32, %arg1: i32) -> (i32, i32) {
    %c0_i32 = arith.constant 0 : i32
    %c0_i32_0 = arith.constant 0 : i32
    %c0_i32_1 = arith.constant 0 : i32
    return %c0_i32, %c0_i32_0 : i32, i32
  }
  func.func @transform_4(%arg0: i32, %arg1: i32) -> (i32, i32) {
    %c0_i32 = arith.constant 0 : i32
    %c0_i32_0 = arith.constant 0 : i32
    %c0_i32_1 = arith.constant 0 : i32
    return %c0_i32, %c0_i32_0 : i32, i32
  }
  func.func @transform_5(%arg0: i32, %arg1: i32) -> (i32, i32) {
    %c0_i32 = arith.constant 0 : i32
    %c0_i32_0 = arith.constant 0 : i32
    return %arg1, %c0_i32 : i32, i32
  }
  func.func @transform_6(%arg0: i32, %arg1: i32) -> (i32, i32) {
    %c0_i32 = arith.constant 0 : i32
    %c0_i32_0 = arith.constant 0 : i32
    return %c0_i32, %arg1 : i32, i32
  }
  func.func @transform_7(%arg0: i32, %arg1: i32) -> (i32, i32) {
    %c0_i32 = arith.constant 0 : i32
    return %arg0, %arg1 : i32, i32
  }
}

</mosaic_0001>

<bundles_post_ra>
// kernel: tpu_custom_call.1
= control target key start
LH: loop header
LB: loop body
LE: loop exit
PB: predicated region body
PF: predicated region fallthrough
CT: control target
= control target key end

     0   :  { %vm57_vm0 = vcmask 261120   ;;  %s776_s0 = inlined_call_operand.vmem [shape: bf16[16,32], index: 0, kind: input, shape index: {}]   ;;  %s777_s1 = inlined_call_operand.vmem [shape: bf16[32,32], index: 1, kind: input, shape index: {}]   ;;  %s778_s2 = inlined_call_operand.vmem [shape: f32[1,32], index: 2, kind: input, shape index: {}]   ;;  %s779_s3 = inlined_call_operand.vmem [shape: f32[1,32], index: 3, kind: input, shape index: {}]   ;;  %s780_s4 = inlined_call_operand.vmem [shape: f32[1,32], index: 4, kind: input, shape index: {}]   ;;  %s781_s5 = inlined_call_operand.vmem [shape: bf16[256,32], index: 5, kind: input, shape index: {}]   ;;  %s782_s6 = inlined_call_operand.vmem [shape: f32[1,256], index: 6, kind: input, shape index: {}]   ;;  %s783_s7 = inlined_call_operand.hbm [shape: f32[16,256], index: 7, kind: output, shape index: {}]  }
   0x1   :  { %v551_v0 = vld [vmem:[%s777_s1 + $0x8] sm:$0xff] }
   0x2   :  { %v65_v1 = vsel %vm57_vm0, %v551_v0, 0 }
   0x3   :  { %12 = vsyncpa [#allocation4], 0  ;;  %73 = vmatpush.bf16.xpose.msra.mxu0 %v65_v1  ;;  %v550_v2 = vld [vmem:[%s777_s1] sm:$0xff]  ;;  %vm234_vm14 = vcmask 257024   ;;  %s613_s15 = smov [#allocation3]   ;;  %s452_s19 = sshll.u32 %s783_s7, 4  ;;  %s453_s19 = int_to_ptr.hbm [resolvable:$true] %s452_s19 }
   0x4   :  { %v62_v3 = vsel %vm57_vm0, %v550_v2, 0  ;;  %v549_v4 = vld [vmem:[%s776_s0] sm:$0xff]  ;;  %s450_s16 = sshll.u32 %s613_s15, 4  ;;  %s615_s20 = smov 16   ;;  %s451_s16 = int_to_ptr.vmem [resolvable:$true] %s450_s16 }
   0x5   :  { %v573_v5 = vld [vmem:[%s778_s2] ss:$0 sm:$0xff] }
   0xb   :  { %74 = vmatpush.bf16.xpose.msra.mxu0 %v62_v3 }
  0x12   :  { %476 = vmatmul.msk.bf16.vlgmr.msra.gmra.mxu0 %vm57_vm0, %v549_v4 }
  0x8f   :  { %v76_v6 = vpop.f32.mrf.mxu0 }
  0x90   :  { %v671_v7 = vadd.f32 %v573_v5, %v76_v6 }
  0x92   :  { %v83_v8 = vmul.f32 0.70710677, %v671_v7 }
  0x94   :  { %v85_v9 = vmul.f32 %v83_v8, %v83_v8 }
  0x96   :  { %v86_v10 = vmin.f32 %v85_v9, 16.0 }
  0x97   :  { %v78_v11 = vpop.f32.mrf.mxu0 }
  0x98   :  { %v87_v12 = vmul.f32 2.1237322e-06, %v86_v10  ;;  %v674_v13 = vadd.f32 %v573_v5, %v78_v11  ;;  %v98_v14 = vmul.f32 3.8918573e-05, %v86_v10 }
  0x9a   :  { %v88_v15 = vadd.f32 0.00028619796, %v87_v12  ;;  %v677_v16 = vmul.f32 0.70710677, %v674_v13  ;;  %v99_v17 = vadd.f32 0.001143296, %v98_v14 }
  0x9c   :  { %v89_v18 = vmul.f32 %v88_v15, %v86_v10  ;;  %v125_v19 = vmul.f32 %v677_v16, %v677_v16  ;;  %v100_v20 = vmul.f32 %v99_v17, %v86_v10  ;;  %v81_v15 = vmul.f32 0.5, %v671_v7 }
  0x9e   :  { %v126_v21 = vmin.f32 %v125_v19, 16.0  ;;  %v101_v22 = vadd.f32 0.014752088, %v100_v20  ;;  %v90_v23 = vadd.f32 0.0036580483, %v89_v18 }
  0xa0   :  { %v127_v24 = vmul.f32 2.1237322e-06, %v126_v21  ;;  %v138_v25 = vmul.f32 3.8918573e-05, %v126_v21  ;;  %v102_v26 = vmul.f32 %v101_v22, %v86_v10  ;;  %v91_v30 = vmul.f32 %v90_v23, %v86_v10 }
  0xa2   :  { %v128_v27 = vadd.f32 0.00028619796, %v127_v24  ;;  %v139_v28 = vadd.f32 0.001143296, %v138_v25  ;;  %v103_v29 = vadd.f32 0.112945676, %v102_v26 }
  0xa3   :  { %v92_v37 = vadd.f32 0.05243302, %v91_v30  ;;  %v82_v25 = vmul.f32 0.5, %v674_v13  ;;  %v560_v30 = vld [vmem:[%s781_s5 + $0x38] sm:$0xff] }
  0xa4   :  { %v129_v31 = vmul.f32 %v128_v27, %v126_v21  ;;  %v140_v32 = vmul.f32 %v139_v28, %v126_v21  ;;  %v104_v33 = vmul.f32 %v103_v29, %v86_v10  ;;  %v612_v28 = vmov 32.0  }
  0xa5   :  { %v93_v43 = vmul.f32 %v92_v37, %v86_v10  ;;  %v388_v13 = vsel %vm57_vm0, %v560_v30, 0 }
  0xa6   :  { %v141_v34 = vadd.f32 0.014752088, %v140_v32  ;;  %v130_v35 = vadd.f32 0.0036580483, %v129_v31  ;;  %v105_v36 = vadd.f32 0.4994258, %v104_v33  ;;  %414 = vmatpush.bf16.xpose.msra.mxu1 %v388_v13 }
  0xa7   :  { %v94_v47 = vadd.f32 0.18741608, %v93_v43  ;;  %v568_v31 = vld [vmem:[%s781_s5 + $0x78] sm:$0xff] }
  0xa8   :  { %v142_v38 = vmul.f32 %v141_v34, %v126_v21  ;;  %v106_v39 = vmul.f32 %v105_v36, %v86_v10  ;;  %v131_v41 = vmul.f32 %v130_v35, %v126_v21  ;;  %v412_v33 = vsel %vm57_vm0, %v568_v31, 0  ;;  %v559_v34 = vld [vmem:[%s781_s5 + $0x30] sm:$0xff] }
  0xa9   :  { %v95_v52 = vmul.f32 %v94_v47, %v86_v10  ;;  %428 = vmatpush.bf16.xpose.msra.mxu2 %v412_v33  ;;  %v567_v35 = vld [vmem:[%s781_s5 + $0x70] sm:$0xff]  ;;  %v385_v37 = vsel %vm57_vm0, %v559_v34, 0 }
  0xaa   :  { %v143_v40 = vadd.f32 0.112945676, %v142_v38  ;;  %v107_v42 = vadd.f32 1.0, %v106_v39  ;;  %v132_v46 = vadd.f32 0.05243302, %v131_v41  ;;  %v409_v38 = vsel %vm57_vm0, %v567_v35, 0 }
  0xab   :  { %v96_v57 = vadd.f32 1.1283791, %v95_v52  ;;  %v566_v52 = vld [vmem:[%s781_s5 + $0x68] sm:$0xff] }
  0xac   :  { %v144_v44 = vmul.f32 %v143_v40, %v126_v21  ;;  %576 = vrcp.f32 %v107_v42  ;;  %v133_v51 = vmul.f32 %v132_v46, %v126_v21  ;;  %v119_v56 = vand.u32 2147483648, %v107_v42 }
  0xad   :  { %v117_v59 = vand.u32 2147483647, %v107_v42  ;;  %vm113_vm2 = vweird.f32 %v107_v42  ;;  %v97_v1 = vmul.f32 %v96_v57, %v83_v8 }
  0xae   :  { %v145_v45 = vadd.f32 0.4994258, %v144_v44  ;;  %v134_v55 = vadd.f32 0.18741608, %v133_v51  ;;  %v120_v63 = vor.u32 1.1754944e-38, %v119_v56  ;;  %415 = vmatpush.bf16.xpose.msra.mxu1 %v385_v37  ;;  %v558_v51 = vld [vmem:[%s781_s5 + $0x28] sm:$0xff] }
  0xaf   :  { %vm118_vm4 = vcmp.eq.f32.partialorder %v117_v59, 8.507059e+37  ;;  %v565_v56 = vld [vmem:[%s781_s5 + $0x60] sm:$0xff]  ;;  %v556_v59 = vld [vmem:[%s781_s5 + $0x18] sm:$0xff] }
  0xb0   :  { %v146_v48 = vmul.f32 %v145_v45, %v126_v21  ;;  %v135_v62 = vmul.f32 %v134_v55, %v126_v21  ;;  %v557_v55 = vld [vmem:[%s781_s5 + $0x20] sm:$0xff] }
  0xb1   :  { %429 = vmatpush.bf16.xpose.msra.mxu2 %v409_v38  ;;  %v379_v57 = vsel %vm57_vm0, %v557_v55, 0 }
  0xb2   :  { %v147_v49 = vadd.f32 1.0, %v146_v48  ;;  %v577_v50 = vpop.eup %576  ;;  %v136_v9 = vadd.f32 1.1283791, %v135_v62 }
  0xb3   :  { %v109_v53 = vmul.f32 %v577_v50, %v107_v42  ;;  %vm114_vm1 = vweird.f32 %v577_v50 }
  0xb4   :  { %578 = vrcp.f32 %v147_v49  ;;  %vm115_vm3 = vmor %vm113_vm2, %vm114_vm1  ;;  %v159_v6 = vand.u32 2147483648, %v147_v49  ;;  %v157_v11 = vand.u32 2147483647, %v147_v49  ;;  %vm153_vm6 = vweird.f32 %v147_v49 }
  0xb5   :  { %v110_v54 = vsub.f32 1.0, %v109_v53  ;;  %v137_v8 = vmul.f32 %v136_v9, %v677_v16  ;;  %580 = vrcp.f32 %v612_v28  ;;  %v382_v53 = vsel %vm57_vm0, %v558_v51, 0 }
  0xb6   :  { %v160_v18 = vor.u32 1.1754944e-38, %v159_v6  ;;  %vm158_vm8 = vcmp.eq.f32.partialorder %v157_v11, 8.507059e+37  ;;  %416 = vmatpush.bf16.xpose.msra.mxu1 %v382_v53 }
  0xb7   :  { %v111_v58 = vmul.f32 %v577_v50, %v110_v54  ;;  %v406_v54 = vsel %vm57_vm0, %v566_v52, 0 }
  0xb9   :  { %v112_v61 = vadd.f32 %v577_v50, %v111_v58  ;;  %430 = vmatpush.bf16.xpose.msra.mxu2 %v406_v54  ;;  %v403_v58 = vsel %vm57_vm0, %v565_v56, 0 }
  0xba   :  { %v579_v60 = vpop.eup %578 }
  0xbb   :  { %v149_v0 = vmul.f32 %v579_v60, %v147_v49  ;;  %v116_v2 = vsel %vm115_vm3, %v577_v50, %v112_v61  ;;  %vm154_vm5 = vweird.f32 %v579_v60  ;;  %v581_v29 = vpop.eup %580  ;;  %v376_v61 = vsel %vm57_vm0, %v556_v59, 0 }
  0xbc   :  { %v121_v3 = vsel %vm118_vm4, %v120_v63, %v116_v2  ;;  %vm155_vm7 = vmor %vm153_vm6, %vm154_vm5  ;;  %v176_v16 = vmul.f32 32.0, %v581_v29  ;;  %vm180_vm9 = vweird.f32 %v581_v29  ;;  %v555_v63 = vld [vmem:[%s781_s5 + $0x10] sm:$0xff] }
  0xbd   :  { %v150_v4 = vsub.f32 1.0, %v149_v0  ;;  %v122_v5 = vmul.f32 %v121_v3, %v97_v1  ;;  %v563_v0 = vld [vmem:[%s781_s5 + $0x50] sm:$0xff]  ;;  %v373_v1 = vsel %vm57_vm0, %v555_v63, 0  ;;  %v554_v3 = vld [vmem:[%s781_s5 + $0x8] sm:$0xff] }
  0xbe   :  { %v177_v32 = vsub.f32 1.0, %v176_v16  ;;  %417 = vmatpush.bf16.xpose.msra.mxu1 %v379_v57  ;;  %v397_v2 = vsel %vm57_vm0, %v563_v0, 0  ;;  %v370_v6 = vsel %vm57_vm0, %v554_v3, 0  ;;  %v575_v16 = vld [vmem:[%s780_s4] ss:$0 sm:$0xff] }
  0xbf   :  { %v151_v10 = vmul.f32 %v579_v60, %v150_v4  ;;  %v477_v12 = vclamps-f32 %v122_v5, 1.0  ;;  %v562_v4 = vld [vmem:[%s781_s5 + $0x48] sm:$0xff] }
  0xc0   :  { %v178_v36 = vmul.f32 %v581_v29, %v177_v32  ;;  %v394_v9 = vsel %vm57_vm0, %v562_v4, 0 }
  0xc1   :  { %v152_v14 = vadd.f32 %v579_v60, %v151_v10  ;;  %v165_v17 = vadd.f32 1.0, %v477_v12  ;;  %431 = vmatpush.bf16.xpose.msra.mxu2 %v403_v58  ;;  %v553_v12 = vld [vmem:[%s781_s5] sm:$0xff] }
  0xc2   :  { %v179_v39 = vadd.f32 %v581_v29, %v178_v36 }
  0xc3   :  { %v156_v19 = vsel %vm155_vm7, %v579_v60, %v152_v14  ;;  %v167_v20 = vmul.f32 %v165_v17, %v81_v15  ;;  %v564_v60 = vld [vmem:[%s781_s5 + $0x58] sm:$0xff]  ;;  %v561_v14 = vld [vmem:[%s781_s5 + $0x40] sm:$0xff]  ;;  %v367_v17 = vsel %vm57_vm0, %v553_v12, 0 }
  0xc4   :  { %v161_v21 = vsel %vm158_vm8, %v160_v18, %v156_v19  ;;  %v181_v40 = vsel %vm180_vm9, %v581_v29, %v179_v39  ;;  %v400_v62 = vsel %vm57_vm0, %v564_v60, 0  ;;  %v391_v18 = vsel %vm57_vm0, %v561_v14, 0 }
  0xc5   :  { %v162_v22 = vmul.f32 %v161_v21, %v137_v8  ;;  %v169_v23 = vsel %vm57_vm0, %v167_v20, 0.0 }
  0xc6   :  { %170 = vadd.xlane.f32.xlu0 %v169_v23  ;;  %418 = vmatpush.bf16.xpose.msra.mxu1 %v376_v61 }
  0xc7   :  { %v478_v24 = vclamps-f32 %v162_v22, 1.0 }
  0xc9   :  { %v166_v26 = vadd.f32 1.0, %v478_v24  ;;  %432 = vmatpush.bf16.xpose.msra.mxu2 %v400_v62 }
  0xcb   :  { %v168_v27 = vmul.f32 %v166_v26, %v82_v25 }
  0xcd   :  { %v172_v7 = vsel %vm57_vm0, %v168_v27, 0.0 }
  0xce   :  { %173 = vadd.xlane.f32.xlu0 %v172_v7  ;;  %419 = vmatpush.bf16.xpose.msra.mxu1 %v373_v1  ;;  %v574_v7 = vld [vmem:[%s779_s3] ss:$0 sm:$0xff] }
  0xd1   :  { %433 = vmatpush.bf16.xpose.msra.mxu2 %v397_v2 }
  0xd6   :  { %420 = vmatpush.bf16.xpose.msra.mxu1 %v370_v6 }
  0xd9   :  { %434 = vmatpush.bf16.xpose.msra.mxu2 %v394_v9 }
  0xde   :  { %421 = vmatpush.bf16.xpose.msra.mxu1 %v367_v17 }
  0xe1   :  { %435 = vmatpush.bf16.xpose.msra.mxu2 %v391_v18 }
 0x139   :  { %v171_v41 = vpop.xlane.xlu0 %170 }
 0x13a   :  { %v182_v42 = vmul.f32 %v181_v40, %v171_v41 }
 0x13c   :  { %v702_v43 = vsub.f32 %v167_v20, %v182_v42  ;;  %v271_v42 = vld [vmem:[%s782_s6] sm:$0x3]  ;;  %s614_s6 = smov 256  }
 0x13e   :  { %v186_v44 = vmul.f32 %v702_v43, %v702_v43 }
 0x140   :  { %v188_v45 = vsel %vm57_vm0, %v186_v44, 0.0 }
 0x141   :  { %189 = vadd.xlane.f32.xlu1 %v188_v45  ;;  %v174_v46 = vpop.xlane.xlu0 %173 }
 0x142   :  { %v183_v47 = vmul.f32 %v181_v40, %v174_v46  ;;  %v274_v46 = vperm.slane %v271_v42, 1 }
 0x144   :  { %v707_v48 = vsub.f32 %v168_v27, %v183_v47 }
 0x146   :  { %v187_v49 = vmul.f32 %v707_v48, %v707_v48 }
 0x148   :  { %v191_v50 = vsel %vm57_vm0, %v187_v49, 0.0 }
 0x149   :  { %192 = vadd.xlane.f32.xlu1 %v191_v50 }
 0x1b4   :  { %v190_v5 = vpop.xlane.xlu1 %189 }
 0x1b5   :  { %v194_v10 = vmul.f32 %v190_v5, %v181_v40 }
 0x1b7   :  { %v196_v11 = vadd.f32 1e-05, %v194_v10 }
 0x1b9   :  { %582 = vrsqrt.f32 %v196_v11  ;;  %vm204_vm11 = vweird.f32 %v196_v11 }
 0x1bc   :  { %v193_v15 = vpop.xlane.xlu1 %192 }
 0x1bd   :  { %v195_v8 = vmul.f32 %v193_v15, %v181_v40 }
 0x1bf   :  { %v583_v19 = vpop.eup %582  ;;  %v197_v20 = vadd.f32 1e-05, %v195_v8 }
 0x1c0   :  { %v199_v21 = vmul.f32 %v583_v19, %v196_v11  ;;  %vm205_vm10 = vweird.f32 %v583_v19 }
 0x1c1   :  { %584 = vrsqrt.f32 %v197_v20  ;;  %vm206_vm12 = vmor %vm204_vm11, %vm205_vm10  ;;  %vm214_vm15 = vweird.f32 %v197_v20 }
 0x1c2   :  { %v200_v22 = vmul.f32 %v583_v19, %v199_v21 }
 0x1c4   :  { %v201_v23 = vmul.f32 0.5, %v200_v22 }
 0x1c6   :  { %v202_v24 = vsub.f32 1.5, %v201_v23 }
 0x1c7   :  { %v585_v25 = vpop.eup %584 }
 0x1c8   :  { %v203_v26 = vmul.f32 %v583_v19, %v202_v24  ;;  %v209_v27 = vmul.f32 %v585_v25, %v197_v20  ;;  %vm215_vm13 = vweird.f32 %v585_v25 }
 0x1c9   :  { %vm216_vm1 = vmor %vm214_vm15, %vm215_vm13 }
 0x1ca   :  { %v207_v28 = vsel %vm206_vm12, %v583_v19, %v203_v26  ;;  %v210_v29 = vmul.f32 %v585_v25, %v209_v27 }
 0x1cb   :  { %v218_v30 = vmul.f32 %v207_v28, %v702_v43  ;;  %v273_v43 = vperm.slane %v271_v42, 0 }
 0x1cc   :  { %v211_v31 = vmul.f32 0.5, %v210_v29 }
 0x1cd   :  { %v224_v32 = vmul.f32 %v574_v7, %v218_v30 }
 0x1ce   :  { %v212_v13 = vsub.f32 1.5, %v211_v31 }
 0x1cf   :  { %v230_v33 = vadd.f32 %v575_v16, %v224_v32 }
 0x1d0   :  { %v213_v34 = vmul.f32 %v585_v25, %v212_v13 }
 0x1d1   :  { %v232_v35 = vpack.c.bf16 %v230_v33, %v230_v33 }
 0x1d2   :  { %v217_v36 = vsel %vm216_vm1, %v585_v25, %v213_v34 }
 0x1d3   :  { %235 = vst.msk [vmem:[#allocation2] sm:$0xf] %vm234_vm14, %v232_v35  ;;  %v219_v37 = vmul.f32 %v217_v36, %v707_v48 }
 0x1d5   :  { %v225_v38 = vmul.f32 %v574_v7, %v219_v37 }
 0x1d7   :  { %v231_v39 = vadd.f32 %v575_v16, %v225_v38 }
 0x1d9   :  { %v233_v40 = vpack.c.bf16 %v231_v39, %v231_v39 }
 0x1db   :  { %236 = vst.msk [vmem:[#allocation2 + $0x4] sm:$0xf] %vm234_vm14, %v233_v40 }
 0x1e2   :  { %v552_v41 = vld [vmem:[#allocation2] sm:$0xff] }
 0x1e3   :  { %547 = vmatmul.msk.bf16.vlgmr.msra.gmra.mxu1 %vm57_vm0, %v552_v41  ;;  %548 = vmatmul.msk.bf16.vlgmr.msra.gmra.mxu2 %vm57_vm0, %v552_v41 }
 0x260   :  { %v423_v44 = vpop.f32.mrf.mxu1 }
 0x261   :  { %v424_v45 = vadd.f32 %v423_v44, %v273_v43 }
 0x263   :  { %442 = vst [vmem:[#allocation3] sm:$0xff] %v424_v45 }
 0x266   :  { %v437_v47 = vpop.f32.mrf.mxu2 }
 0x267   :  { %v438_v48 = vadd.f32 %v437_v47, %v274_v46 }
 0x268   :  { %v425_v49 = vpop.f32.mrf.mxu1 }
 0x269   :  { %443 = vst [vmem:[#allocation3 + $0x8] sm:$0xff] %v438_v48  ;;  %v426_v50 = vadd.f32 %v425_v49, %v273_v43 }
 0x26b   :  { %444 = vst [vmem:[#allocation3 + $0x10] sm:$0xff] %v426_v50 }
 0x26e   :  { %v439_v51 = vpop.f32.mrf.mxu2 }
 0x26f   :  { %v440_v52 = vadd.f32 %v439_v51, %v274_v46 }
 0x271   :  { %445 = vst [vmem:[#allocation3 + $0x18] sm:$0xff] %v440_v52 }
 0x272   :  { %458 = dma.vmem_to_hbm [thread:$0]  %s451_s16, 512, %s453_s19, [#allocation4], %s614_s6, %s614_s6, %s615_s20  }
 0x273   :  { %610 = dma.done.wait [#allocation4], 512  }
 0x274   :  { %611 = vsyncadd [#allocation4], 4294966784 }
 0x275   :  { %463 = vsyncpa [#allocation4], 1 }

</bundles_post_ra>
